<compile_context>
chip_gen: v7x
topology: tpu7x:2x2x1
jax: 0.10.0
libtpu: 0.0.40
codegen_flags: <defaults>
</compile_context>

<pallas_src>
import functools

import jax
import jax.numpy as jnp
from jax import lax
from jax.experimental import pallas as pl
from jax.experimental.pallas import tpu as pltpu

_LANE_CHOICES = (1024, 896, 768, 640, 512, 384, 256, 128)
_TARGET_BLOCK_BYTES = 4 << 20   # per-input block (double-buffered by Pallas)
_TARGET_GROUP_BYTES = 1 << 20   # per-group f32 diff temporary inside the kernel
_VMEM_LIMIT_BYTES = 48 << 20    # < 64 MiB physical (v7x); above scoped defaults


def _round_up(x: int, m: int) -> int:
    return ((x + m - 1) // m) * m


def _pick_lanes(n_elems: int) -> int:
    """Widest multiple-of-128 lane count dividing n_elems (prefer rows >= 8)."""
    divisors = [c for c in _LANE_CHOICES if n_elems % c == 0]
    for c in divisors:
        if n_elems // c >= 8:
            return c
    if divisors:
        return divisors[0]
    return 1024  # no multiple-of-128 divisor: main rows in kernel, tail in JAX


def _compose_partial_kernel(pred_ref, target_ref, acc_ref, *,
                            rows_valid, row_tile, group, blocks_per_core):
    """Accumulate [sum((p-t)^2), sum(|p-t|)] for this core's row range.

    acc_ref: (1, 2, 8, lanes) f32 output block that stays resident across the
    'arbitrary' grid axis (classic init / accumulate / auto-writeback).
    """
    c = pl.program_id(0)   # core (parallel axis)
    i = pl.program_id(1)   # row-block within this core (reduction axis)

    @pl.when(i == 0)
    def _init():
        acc_ref[...] = jnp.zeros_like(acc_ref)

    lanes = pred_ref.shape[1]
    # Nominal first row of this tile.  For tiles whose index_map was clamped
    # (fully out-of-range duplicates) every nominal row id is >= rows_valid,
    # so the mask zeroes the whole contribution; for the genuine ragged edge
    # block only the invalid padding rows are zeroed.
    base_row = (c * blocks_per_core + i) * row_tile
    n_groups = row_tile // group

    def body(g, carry):
        r0 = pl.multiple_of(g * group, group)
        p = pred_ref[pl.ds(r0, group), :].astype(jnp.float32)
        t = target_ref[pl.ds(r0, group), :].astype(jnp.float32)
        d = p - t
        row_ids = base_row + r0 + lax.broadcasted_iota(jnp.int32, (group, lanes), 0)
        d = jnp.where(row_ids < rows_valid, d, 0.0)
        # Partial reduce to an (8, lanes) vreg-shaped slab: the sublane axis is
        # split into groups of 8 and summed over the group axis (pure VPU
        # elementwise adds, no cross-lane / XLU work per grid step).
        sq = (d * d).reshape(group // 8, 8, lanes).sum(axis=0)
        ab = jnp.abs(d).reshape(group // 8, 8, lanes).sum(axis=0)
        acc_ref[0, 0] += sq
        acc_ref[0, 1] += ab
        return carry

    lax.fori_loop(0, n_groups, body, 0, unroll=(n_groups <= 4))


def compose_loss(pred, target, weights):
    """Pallas equivalent of ComposeLoss([MSE, L1], weights).forward(pred, target)."""
    assert pred.shape == target.shape, "pred/target must have the same shape"
    weights = jnp.asarray(weights, dtype=jnp.float32)
    n_elems = int(pred.size)
    itemsize = jnp.dtype(pred.dtype).itemsize

    flat_p = pred.reshape(-1)      # free bitcast for contiguous inputs
    flat_t = target.reshape(-1)

    lanes = _pick_lanes(n_elems)
    rows = n_elems // lanes
    rem = n_elems - rows * lanes

    def _weighted(sq_sum, ab_sum):
        inv_n = jnp.float32(1.0 / n_elems)
        return weights[0] * (sq_sum * inv_n) + weights[1] * (ab_sum * inv_n)

    # Tiny inputs (fewer than 8 full rows): a kernel launch is pure overhead.
    if rows < 8:
        d = flat_p.astype(jnp.float32) - flat_t.astype(jnp.float32)
        return _weighted(jnp.sum(d * d), jnp.sum(jnp.abs(d)))

    if rem == 0:
        pred2d = flat_p.reshape(rows, lanes)        # free reshape, no copy
        target2d = flat_t.reshape(rows, lanes)
    else:
        # n_elems has no multiple-of-128 divisor: kernel covers the full rows,
        # the <lanes leftover elements are handled in plain JAX below.  (XLA
        # may materialize this prefix view; unavoidable without padding.)
        pred2d = flat_p[: rows * lanes].reshape(rows, lanes)
        target2d = flat_t[: rows * lanes].reshape(rows, lanes)

    # ---- Tile geometry -----------------------------------------------------
    group_cap = (rows // 8) * 8                                    # >= 8, <= rows
    group = min(group_cap, max(8, (_TARGET_GROUP_BYTES // (lanes * 4)) // 8 * 8))
    target_rows = max(group,
                      (_TARGET_BLOCK_BYTES // (lanes * itemsize)) // group * group)
    row_tile = min(target_rows, (rows // group) * group)           # <= rows

    total_blocks = pl.cdiv(rows, row_tile)
    ncores = 2 if total_blocks >= 2 else 1     # v7x has 2 TCs; harmless elsewhere
    bpc = pl.cdiv(total_blocks, ncores)
    last_block = total_blocks - 1

    kernel = functools.partial(
        _compose_partial_kernel,
        rows_valid=rows, row_tile=row_tile, group=group, blocks_per_core=bpc)

    # Clamp fully out-of-range nominal blocks onto the last real block; the
    # in-kernel row mask zeroes their (duplicated) contribution.
    in_map = lambda c, i: (jnp.minimum(c * bpc + i, last_block), 0)
    out_map = lambda c, i: (c, 0, 0, 0)        # constant over the reduction axis

    partials = pl.pallas_call(
        kernel,
        out_shape=jax.ShapeDtypeStruct((ncores, 2, 8, lanes), jnp.float32),
        grid_spec=pltpu.PrefetchScalarGridSpec(
            num_scalar_prefetch=0,
            grid=(ncores, bpc),
            in_specs=[
                pl.BlockSpec((row_tile, lanes), in_map),
                pl.BlockSpec((row_tile, lanes), in_map),
            ],
            out_specs=pl.BlockSpec((1, 2, 8, lanes), out_map),
        ),
        compiler_params=pltpu.CompilerParams(
            dimension_semantics=("parallel", "arbitrary"),
            vmem_limit_bytes=_VMEM_LIMIT_BYTES,
        ),
        cost_estimate=pl.CostEstimate(
            flops=5 * rows * lanes,
            transcendentals=0,
            bytes_accessed=2 * rows * lanes * itemsize + ncores * 2 * 8 * lanes * 4,
        ),
    )(pred2d, target2d)

    sq_sum = jnp.sum(partials[:, 0])
    ab_sum = jnp.sum(partials[:, 1])

    if rem:
        # < lanes leftover elements: negligible traffic, plain JAX.
        tp = flat_p[rows * lanes:].astype(jnp.float32)
        tt = flat_t[rows * lanes:].astype(jnp.float32)
        td = tp - tt
        sq_sum = sq_sum + jnp.sum(td * td)
        ab_sum = ab_sum + jnp.sum(jnp.abs(td))

    return _weighted(sq_sum, ab_sum)


def _reference(pred, target, weights):
    d = pred.astype(jnp.float32) - target.astype(jnp.float32)
    return weights[0] * jnp.mean(d * d) + weights[1] * jnp.mean(jnp.abs(d))


if __name__ == "__main__":
    key = jax.random.PRNGKey(0)
    k0, k1, k2, k3 = jax.random.split(key, 4)

    # Deterministic "module init": two losses (MSE, L1) with these weights.
    weights = jnp.array([0.7, 0.3], dtype=jnp.float32)

    # Check 1: the module's nominal small shape.
    B, C, H, W = 2, 4, 16, 16
    pred = jax.random.normal(k0, (B, C, H, W), dtype=jnp.float32)
    target = jax.random.normal(k1, (B, C, H, W), dtype=jnp.float32)
    loss = jax.block_until_ready(compose_loss(pred, target, weights))
    ref = _reference(pred, target, weights)
    assert jnp.allclose(loss, ref, rtol=1e-5, atol=1e-6), (loss, ref)

    # Check 2: exercises multi-block grid, both-core split, the chunked inner
    # loop and the ragged-edge row mask (rows = 528, row_tile = 512).
    pred2 = jax.random.normal(k2, (8, 64, 32, 33), dtype=jnp.float32)
    target2 = jax.random.normal(k3, (8, 64, 32, 33), dtype=jnp.float32)
    loss2 = jax.block_until_ready(compose_loss(pred2, target2, weights))
    ref2 = _reference(pred2, target2, weights)
    assert jnp.allclose(loss2, ref2, rtol=1e-5, atol=1e-5), (loss2, ref2)

    print("KERNEL_OK")
</pallas_src>

<mosaic_0001>
module attributes {stable_mosaic.version = 11 : i64} {
  func.func @_compose_partial_kernel(%arg0: i32, %arg1: i32, %arg2: memref<8x256xf32, #tpu.memory_space<vmem>>, %arg3: memref<8x256xf32, #tpu.memory_space<vmem>>, %arg4: memref<1x2x8x256xf32, #tpu.memory_space<vmem>>) attributes {dimension_semantics = [#tpu.dimension_semantics<parallel>, #tpu.dimension_semantics<arbitrary>], iteration_bounds = array<i64: 1, 1>, scalar_prefetch = 0 : i64, scratch_operands = 0 : i64, tpu.core_type = #tpu.core_type<tc>, window_params = [{transform_indices = @transform_0, window_bounds = array<i64: 8, 256>}, {transform_indices = @transform_1, window_bounds = array<i64: 8, 256>}, {transform_indices = @transform_2, window_bounds = array<i64: 1, 2, 8, 256>}]} {
    %c0_i32 = arith.constant 0 : i32
    %0 = arith.cmpi eq, %arg1, %c0_i32 : i32
    %1 = arith.extui %0 : i1 to i32
    %c0_i32_0 = arith.constant 0 : i32
    %2 = arith.cmpi ne, %1, %c0_i32_0 : i32
    scf.if %2 {
      %cst_23 = arith.constant 0.000000e+00 : f32
      %39 = vector.broadcast %cst_23 : f32 to vector<1x2x8x256xf32>
      %c0_24 = arith.constant 0 : index
      %c0_25 = arith.constant 0 : index
      %c0_26 = arith.constant 0 : index
      %c0_27 = arith.constant 0 : index
      %40 = vector.load %arg4[%c0_24, %c0_25, %c0_26, %c0_27] : memref<1x2x8x256xf32, #tpu.memory_space<vmem>>, vector<1x2x8x256xf32>
      tpu.vector_store %arg4[%c0_24, %c0_25, %c0_26, %c0_27], %39 {strides = array<i32>} : memref<1x2x8x256xf32, #tpu.memory_space<vmem>>, vector<1x2x8x256xf32>,
    } else {
    }
    %c1_i32 = arith.constant 1 : i32
    %3 = arith.muli %arg0, %c1_i32 : i32
    %4 = arith.addi %3, %arg1 : i32
    %c8_i32 = arith.constant 8 : i32
    %5 = arith.muli %4, %c8_i32 : i32
    %c0_i32_1 = arith.constant 0 : i32
    %c8_i32_2 = arith.constant 8 : i32
    %6 = arith.muli %c0_i32_1, %c8_i32_2 : i32
    %7 = tpu.assume_multiple %6, 8 : i32
    %8 = arith.index_cast %7 : i32 to index
    %c0 = arith.constant 0 : index
    %9 = vector.load %arg2[%8, %c0] : memref<8x256xf32, #tpu.memory_space<vmem>>, vector<8x256xf32>
    %10 = arith.index_cast %7 : i32 to index
    %c0_3 = arith.constant 0 : index
    %11 = vector.load %arg3[%10, %c0_3] : memref<8x256xf32, #tpu.memory_space<vmem>>, vector<8x256xf32>
    %12 = arith.subf %9, %11 : vector<8x256xf32>
    %13 = arith.addi %5, %7 : i32
    %14 = tpu.iota {dimensions = array<i32: 0>} : vector<8x256xi32>
    %15 = vector.broadcast %13 : i32 to vector<8x256xi32>
    %16 = arith.addi %15, %14 : vector<8x256xi32>
    %c8_i32_4 = arith.constant 8 : i32
    %17 = vector.broadcast %c8_i32_4 : i32 to vector<8x256xi32>
    %18 = arith.cmpi slt, %16, %17 : vector<8x256xi32>
    %cst = arith.constant 0.000000e+00 : f32
    %19 = vector.broadcast %cst : f32 to vector<8x256xf32>
    %20 = arith.select %18, %12, %19 : vector<8x256xi1>, vector<8x256xf32>
    %21 = arith.mulf %20, %20 : vector<8x256xf32>
    %22 = vector.shape_cast %21 : vector<8x256xf32> to vector<1x8x256xf32>
    %cst_5 = arith.constant dense<0.000000e+00> : vector<8x256xf32>
    %23 = vector.multi_reduction <add>, %22, %cst_5 [0] : vector<1x8x256xf32> to vector<8x256xf32>
    %24 = math.absf %20 : vector<8x256xf32>
    %25 = vector.shape_cast %24 : vector<8x256xf32> to vector<1x8x256xf32>
    %cst_6 = arith.constant dense<0.000000e+00> : vector<8x256xf32>
    %26 = vector.multi_reduction <add>, %25, %cst_6 [0] : vector<1x8x256xf32> to vector<8x256xf32>
    %c0_7 = arith.constant 0 : index
    %c0_8 = arith.constant 0 : index
    %c0_9 = arith.constant 0 : index
    %c0_10 = arith.constant 0 : index
    %27 = vector.load %arg4[%c0_7, %c0_8, %c0_9, %c0_10] : memref<1x2x8x256xf32, #tpu.memory_space<vmem>>, vector<1x1x8x256xf32>
    %28 = vector.shape_cast %27 : vector<1x1x8x256xf32> to vector<8x256xf32>
    %29 = arith.addf %28, %23 : vector<8x256xf32>
    %c0_11 = arith.constant 0 : index
    %c0_12 = arith.constant 0 : index
    %c0_13 = arith.constant 0 : index
    %c0_14 = arith.constant 0 : index
    %30 = vector.load %arg4[%c0_11, %c0_12, %c0_13, %c0_14] : memref<1x2x8x256xf32, #tpu.memory_space<vmem>>, vector<1x1x8x256xf32>
    %31 = vector.shape_cast %30 : vector<1x1x8x256xf32> to vector<8x256xf32>
    %32 = vector.shape_cast %29 : vector<8x256xf32> to vector<1x1x8x256xf32>
    tpu.vector_store %arg4[%c0_11, %c0_12, %c0_13, %c0_14], %32 {strides = array<i32>} : memref<1x2x8x256xf32, #tpu.memory_space<vmem>>, vector<1x1x8x256xf32>,
    %c0_15 = arith.constant 0 : index
    %c1 = arith.constant 1 : index
    %c0_16 = arith.constant 0 : index
    %c0_17 = arith.constant 0 : index
    %33 = vector.load %arg4[%c0_15, %c1, %c0_16, %c0_17] : memref<1x2x8x256xf32, #tpu.memory_space<vmem>>, vector<1x1x8x256xf32>
    %34 = vector.shape_cast %33 : vector<1x1x8x256xf32> to vector<8x256xf32>
    %35 = arith.addf %34, %26 : vector<8x256xf32>
    %c0_18 = arith.constant 0 : index
    %c1_19 = arith.constant 1 : index
    %c0_20 = arith.constant 0 : index
    %c0_21 = arith.constant 0 : index
    %36 = vector.load %arg4[%c0_18, %c1_19, %c0_20, %c0_21] : memref<1x2x8x256xf32, #tpu.memory_space<vmem>>, vector<1x1x8x256xf32>
    %37 = vector.shape_cast %36 : vector<1x1x8x256xf32> to vector<8x256xf32>
    %38 = vector.shape_cast %35 : vector<8x256xf32> to vector<1x1x8x256xf32>
    tpu.vector_store %arg4[%c0_18, %c1_19, %c0_20, %c0_21], %38 {strides = array<i32>} : memref<1x2x8x256xf32, #tpu.memory_space<vmem>>, vector<1x1x8x256xf32>,
    %c1_i32_22 = arith.constant 1 : i32
    return
  }
  func.func @transform_0(%arg0: i32, %arg1: i32) -> (i32, i32) {
    %c1_i32 = arith.constant 1 : i32
    %0 = arith.muli %arg0, %c1_i32 : i32
    %1 = arith.addi %0, %arg1 : i32
    %c0_i32 = arith.constant 0 : i32
    %2 = arith.minsi %1, %c0_i32 : i32
    %c0_i32_0 = arith.constant 0 : i32
    %c0_i32_1 = arith.constant 0 : i32
    return %2, %c0_i32_0 : i32, i32
  }
  func.func @transform_1(%arg0: i32, %arg1: i32) -> (i32, i32) {
    %c1_i32 = arith.constant 1 : i32
    %0 = arith.muli %arg0, %c1_i32 : i32
    %1 = arith.addi %0, %arg1 : i32
    %c0_i32 = arith.constant 0 : i32
    %2 = arith.minsi %1, %c0_i32 : i32
    %c0_i32_0 = arith.constant 0 : i32
    %c0_i32_1 = arith.constant 0 : i32
    return %2, %c0_i32_0 : i32, i32
  }
  func.func @transform_2(%arg0: i32, %arg1: i32) -> (i32, i32, i32, i32) {
    %c0_i32 = arith.constant 0 : i32
    %c0_i32_0 = arith.constant 0 : i32
    %c0_i32_1 = arith.constant 0 : i32
    %c0_i32_2 = arith.constant 0 : i32
    return %arg0, %c0_i32, %c0_i32_0, %c0_i32_1 : i32, i32, i32, i32
  }
}

</mosaic_0001>

<bundles_post_ra>
// kernel: tpu_custom_call.1
= control target key start
LH: loop header
LB: loop body
LE: loop exit
PB: predicated region body
PF: predicated region fallthrough
CT: control target
= control target key end

     0   :  { %7 = vsyncpa [#allocation3], 0  ;;  %s260_s0 = inlined_call_operand.hbm [shape: f32[8,256], index: 0, kind: input, shape index: {}]   ;;  %s261_s1 = inlined_call_operand.hbm [shape: f32[8,256], index: 1, kind: input, shape index: {}]   ;;  %s262_s2 = inlined_call_operand.hbm [shape: f32[1,2,8,256], index: 2, kind: output, shape index: {}]  }
   0x1   :  { %8 = vsyncpa [#allocation6], 0 }
   0x2   :  { %9 = vsyncpa [#allocation4], 0  ;;  %s204_s9 = smov [#allocation2]   ;;  %s205_s11 = smov [#allocation5]  }
   0x3   :  { %s22_s10 = sshll.u32 %s204_s9, 4  ;;  %s38_s12 = sshll.u32 %s205_s11, 4  ;;  %s23_s10 = int_to_ptr.vmem [resolvable:$true] %s22_s10  ;;  %s39_s12 = int_to_ptr.vmem [resolvable:$true] %s38_s12 }
   0x4   :  { %s132_s15 = scalar_lea.hbm %s260_s0, 256 }
   0x5   :  { %p133_p0 = scmp.ne.s32.totalorder %s260_s0, %s132_s15  ;;  %p136_p1 = scmp.lt.u32.totalorder %s132_s15, %s260_s0 }
   0x7   :  { %p138_p2 = pnand %p136_p1, %p133_p0 }
   0x9   :  { %141 = shalt.err (!%p138_p2)
}
   0xa   :  { %s142_s20 = scalar_lea.vmem %s23_s10, 256  ;;  %p147_p4 = scmp.lt.s32.totalorder %s23_s10, %s23_s10 }
   0xb   :  { %p143_p3 = scmp.ne.s32.totalorder %s23_s10, %s142_s20  ;;  %p148_p5 = scmp.lt.s32.totalorder %s142_s20, %s142_s20 }
   0xd   :  { %p149_p6 = por %p148_p5, %p147_p4 }
   0xf   :  { %p150_p7 = pnand %p149_p6, %p143_p3 }
  0x11   :  { %153 = shalt.err (!%p150_p7)
}
  0x12   :  { %25 = dma.hbm_to_vmem [thread:$0]  %s260_s0, 256, %s23_s10, [#allocation3]  }
  0x13   :  { %s154_s25 = scalar_lea.hbm %s261_s1, 256 }
  0x14   :  { %p155_p8 = scmp.ne.s32.totalorder %s261_s1, %s154_s25  ;;  %p158_p9 = scmp.lt.u32.totalorder %s154_s25, %s261_s1 }
  0x16   :  { %p160_p10 = pnand %p158_p9, %p155_p8 }
  0x18   :  { %163 = shalt.err (!%p160_p10)
}
  0x19   :  { %s164_s30 = scalar_lea.vmem %s39_s12, 256  ;;  %p169_p12 = scmp.lt.s32.totalorder %s39_s12, %s39_s12 }
  0x1a   :  { %p165_p11 = scmp.ne.s32.totalorder %s39_s12, %s164_s30  ;;  %p170_p13 = scmp.lt.s32.totalorder %s164_s30, %s164_s30 }
  0x1c   :  { %p171_p0 = por %p170_p13, %p169_p12 }
  0x1e   :  { %p172_p1 = pnand %p171_p0, %p165_p11 }
  0x20   :  { %175 = shalt.err (!%p172_p1)
}
  0x21   :  { %41 = dma.hbm_to_vmem [thread:$0]  %s261_s1, 256, %s39_s12, [#allocation6]  }
  0x22   :  { %198 = dma.done.wait [#allocation3], 256  }
  0x23   :  { %199 = vsyncadd [#allocation3], 4294967040 }
  0x24   :  { %200 = dma.done.wait [#allocation6], 256  }
  0x25   :  { %201 = vsyncadd [#allocation6], 4294967040  ;;  %v67_v0 = vld [vmem:[#allocation2] sm:$0xff]  ;;  %v71_v1 = vld [vmem:[#allocation5] sm:$0xff]  ;;  %s206_s4 = smov [#allocation7]  }
  0x26   :  { %v68_v2 = vld [vmem:[#allocation2 + $0x8] sm:$0xff]  ;;  %v73_v3 = vsub.f32 %v67_v0, %v71_v1  ;;  %v72_v4 = vld [vmem:[#allocation5 + $0x8] sm:$0xff]  ;;  %s109_s5 = sshll.u32 %s206_s4, 4  ;;  %s110_s5 = int_to_ptr.vmem [resolvable:$true] %s109_s5 }
  0x27   :  { %v74_v5 = vsub.f32 %v68_v2, %v72_v4  ;;  %s176_s1 = scalar_lea.vmem %s110_s5, 512  ;;  %p181_p3 = scmp.lt.s32.totalorder %s110_s5, %s110_s5 }
  0x28   :  { %v83_v6 = vmul.f32 %v73_v3, %v73_v3  ;;  %v87_v7 = vand.u32 2147483647, %v73_v3  ;;  %p177_p2 = scmp.ne.s32.totalorder %s110_s5, %s176_s1  ;;  %p182_p4 = scmp.lt.s32.totalorder %s176_s1, %s176_s1 }
  0x29   :  { %v84_v8 = vmul.f32 %v74_v5, %v74_v5  ;;  %v88_v9 = vand.u32 2147483647, %v74_v5 }
  0x2a   :  { %95 = vst [vmem:[#allocation7] sm:$0xff] %v83_v6  ;;  %102 = vst [vmem:[#allocation7 + $0x10] sm:$0xff] %v87_v7  ;;  %p183_p5 = por %p182_p4, %p181_p3 }
  0x2b   :  { %96 = vst [vmem:[#allocation7 + $0x8] sm:$0xff] %v84_v8  ;;  %103 = vst [vmem:[#allocation7 + $0x18] sm:$0xff] %v88_v9 }
  0x2c   :  { %p184_p6 = pnand %p183_p5, %p177_p2 }
  0x2e   :  { %187 = shalt.err (!%p184_p6)
}
  0x2f   :  { %s188_s8 = scalar_lea.hbm %s262_s2, 512 }
  0x30   :  { %p189_p7 = scmp.ne.s32.totalorder %s262_s2, %s188_s8  ;;  %p192_p8 = scmp.lt.u32.totalorder %s188_s8, %s262_s2 }
  0x32   :  { %p194_p9 = pnand %p192_p8, %p189_p7 }
  0x34   :  { %197 = shalt.err (!%p194_p9)
}
  0x35   :  { %s207_s13 = smov 256   ;;  %s208_s14 = smov 16  }
  0x36   :  { %115 = dma.vmem_to_hbm [thread:$0]  %s110_s5, 512, %s262_s2, [#allocation4], %s207_s13, %s207_s13, %s208_s14  }
  0x37   :  { %202 = dma.done.wait [#allocation4], 512  }
  0x38   :  { %203 = vsyncadd [#allocation4], 4294966784 }
  0x39   :  { %119 = vsyncpa [#allocation3], 1 }
  0x3a   :  { %120 = vsyncpa [#allocation6], 1 }
  0x3b   :  { %121 = vsyncpa [#allocation4], 1 }

</bundles_post_ra>
